<compile_context>
chip_gen: v5e
topology: v5e:2x2
jax: 0.10.0
libtpu: 0.0.40
codegen_flags: <defaults>
</compile_context>

<pallas_src>
import functools

import jax
import jax.numpy as jnp
import numpy as np
from jax import lax
from jax.experimental import pallas as pl
from jax.experimental.pallas import tpu as pltpu

LN_EPS = 1e-5  # torch.nn.LayerNorm default


def temporal_predictor_kernel(x_ref, mask_ref, w0_ref, w1_ref, p_ref, fcb_ref,
                              out_ref, *, kernel_size):
    K = kernel_size
    pad = K // 2
    P, T = out_ref.shape

    # Masked input in its native (T, C) layout (time on sublanes, channels on lanes).
    x = x_ref[...] * mask_ref[...]                            # (T, C) * (T, 1)

    # Conv boundary masks: time is on the lane axis of every conv *result*, so one set
    # of (1, T) lane masks is computed once and shared by both layers.
    t_lane = lax.broadcasted_iota(jnp.int32, (1, T), 1)
    shifts = [pad - k for k in range(K)]
    valid = {s: (t_lane >= s) & (t_lane < T + s) for s in shifts if s != 0}

    def conv_relu_norm(v, w_ref, rhs_contract, bias, gamma, beta):
        # Conv1d(pad=K//2) as K per-tap MXU matmuls on the unshifted activation; the
        # tap shift is applied to the (F, T) partial result with a lane roll +
        # boundary mask (no (K*C, T) concat temporary, no sublane shifts).
        v_bf16 = v.astype(jnp.bfloat16)                       # cast once per layer
        acc = None
        for k in range(K):
            pk = lax.dot_general(w_ref[k], v_bf16,
                                 (((1,), (rhs_contract,)), ((), ())),
                                 preferred_element_type=jnp.float32)      # (F, T) f32
            s = pad - k
            if s != 0:
                pk = jnp.where(valid[s], pltpu.roll(pk, shift=s % T, axis=1), 0.0)
            acc = pk if acc is None else acc + pk
        acc = jnp.maximum(acc + bias, 0.0)                    # conv bias + ReLU
        # Two-pass LayerNorm over channels (= sublanes), all f32.
        mu = jnp.mean(acc, axis=0, keepdims=True)             # (1, T)
        d = acc - mu
        var = jnp.mean(d * d, axis=0, keepdims=True)
        return d * lax.rsqrt(var + LN_EPS) * gamma + beta
        # TODO(synk): dropout is identity at inference; training-mode dropout not implemented.

    # Layer 1: activation is (T, C) -> contract the rhs lane axis (dim 1).
    h = conv_relu_norm(x, w0_ref, 1,
                       p_ref[:, 0:1], p_ref[:, 1:2], p_ref[:, 2:3])
    # Layer 2: activation is (F, T) -> contract the rhs sublane axis (dim 0).
    h = conv_relu_norm(h, w1_ref, 0,
                       p_ref[:, 3:4], p_ref[:, 4:5], p_ref[:, 5:6])

    # Linear(filter_size -> n_predictions); fcw lives in columns 6.. of the slab.
    if P == 1:
        # Degenerate head: VPU multiply + sublane reduce beats a (.,F)@(F,1) matmul.
        y = jnp.sum(h * p_ref[:, 6:7], axis=0, keepdims=True) + fcb_ref[0]
    else:
        y = lax.dot_general(p_ref[:, 6:6 + P], h, (((0,), (0,)), ((), ())),
                            preferred_element_type=jnp.float32)           # (P, T)
        fcb_col = jnp.concatenate(
            [jnp.full((1, 1), fcb_ref[pp], dtype=jnp.float32) for pp in range(P)],
            axis=0)                                                        # (P, 1)
        y = y + fcb_col

    out_ref[...] = y.astype(out_ref.dtype)


def temporal_predictor(enc_out, enc_out_mask, params):
    """enc_out: (B, T, input_size) f32; enc_out_mask: (B, T, 1) f32 -> (B, T, P)."""
    B, T, C_in = enc_out.shape
    w0, b0, g0, beta0, w1, b1, g1, beta1, fcw, fcb = params
    K, _, F = w0.shape
    P = fcw.shape[1]

    # Per-tap conv weights as (K, Cout, Cin) slabs, bf16 for the MXU (accumulation
    # stays f32 via preferred_element_type).
    w0t = jnp.transpose(w0, (0, 2, 1)).astype(jnp.bfloat16)       # (K, F, C_in)
    w1t = jnp.transpose(w1, (0, 2, 1)).astype(jnp.bfloat16)       # (K, F, F)
    # One constant slab: columns = [b0, g0, beta0, b1, g1, beta1, fcw[:,0..P-1]].
    pslab = jnp.concatenate([b0.T, g0.T, beta0.T, b1.T, g1.T, beta1.T,
                             fcw.astype(jnp.float32)], axis=1)    # (F, 6 + P)
    fcb_s = fcb.reshape(P).astype(jnp.float32)                    # SMEM scalars

    kernel = functools.partial(temporal_predictor_kernel, kernel_size=K)

    flops = 2 * B * T * (K * C_in * F + K * F * F + F * P)
    bytes_accessed = (4 * B * T * (C_in + 1 + P)                  # activations + mask + out
                      + 2 * K * F * (C_in + F)                    # bf16 conv weights
                      + 4 * F * (6 + P) + 4 * P)                  # param slab + fcb

    out_npt = pl.pallas_call(
        kernel,
        out_shape=jax.ShapeDtypeStruct((B, P, T), jnp.float32),
        grid_spec=pltpu.PrefetchScalarGridSpec(
            num_scalar_prefetch=0,
            grid=(B,),
            in_specs=[
                pl.BlockSpec((None, T, C_in), lambda b: (b, 0, 0)),   # enc_out, native layout
                pl.BlockSpec((None, T, 1), lambda b: (b, 0, 0)),      # mask, native layout
                pl.BlockSpec(w0t.shape, lambda b: (0, 0, 0)),
                pl.BlockSpec(w1t.shape, lambda b: (0, 0, 0)),
                pl.BlockSpec(pslab.shape, lambda b: (0, 0)),
                pl.BlockSpec(memory_space=pltpu.MemorySpace.SMEM),    # fcb scalars
            ],
            out_specs=pl.BlockSpec((None, P, T), lambda b: (b, 0, 0)),
        ),
        compiler_params=pltpu.CompilerParams(
            dimension_semantics=("parallel",),
            vmem_limit_bytes=32 * 1024 * 1024),
        cost_estimate=pl.CostEstimate(
            flops=flops, transcendentals=2 * B * T, bytes_accessed=bytes_accessed),
    )(enc_out, enc_out_mask, w0t, w1t, pslab, fcb_s)

    # Tiny (B*T*P) epilogue: reorder to (B, T, P) and apply the output mask.  For P=1
    # the transpose is a free reshape and the multiply fuses with it.
    return jnp.transpose(out_npt, (0, 2, 1)) * enc_out_mask


def reference(enc_out, enc_out_mask, params):
    """Pure-JAX f32 reference matching the PyTorch forward semantics."""
    w0, b0, g0, beta0, w1, b1, g1, beta1, fcw, fcb = params
    K = w0.shape[0]
    pad = K // 2
    T = enc_out.shape[1]

    x = enc_out * enc_out_mask
    for (w, b, g, beta) in ((w0, b0, g0, beta0), (w1, b1, g1, beta1)):
        xp = jnp.pad(x, ((0, 0), (pad, pad), (0, 0)))
        acc = b[None]                                          # (1, 1, cout)
        for k in range(K):
            acc = acc + jnp.einsum("btc,cf->btf", xp[:, k:k + T, :], w[k])
        acc = jnp.maximum(acc, 0.0)
        mu = jnp.mean(acc, axis=-1, keepdims=True)
        var = jnp.mean(jnp.square(acc - mu), axis=-1, keepdims=True)
        x = (acc - mu) * lax.rsqrt(var + LN_EPS) * g + beta
    y = jnp.einsum("btf,fp->btp", x, fcw) + fcb
    return y * enc_out_mask


def make_params(key, input_size, filter_size, kernel_size, n_predictions):
    ks = jax.random.split(key, 6)
    scale0 = 1.0 / np.sqrt(input_size * kernel_size)
    scale1 = 1.0 / np.sqrt(filter_size * kernel_size)
    scale_fc = 1.0 / np.sqrt(filter_size)
    # Conv weights stored as (K, Cin, Cout); biases / LN params as (1, C).
    w0 = jax.random.uniform(ks[0], (kernel_size, input_size, filter_size),
                            jnp.float32, -scale0, scale0)
    b0 = jax.random.uniform(ks[1], (1, filter_size), jnp.float32, -scale0, scale0)
    g0 = jnp.ones((1, filter_size), jnp.float32)
    beta0 = jnp.zeros((1, filter_size), jnp.float32)
    w1 = jax.random.uniform(ks[2], (kernel_size, filter_size, filter_size),
                            jnp.float32, -scale1, scale1)
    b1 = jax.random.uniform(ks[3], (1, filter_size), jnp.float32, -scale1, scale1)
    g1 = jnp.ones((1, filter_size), jnp.float32)
    beta1 = jnp.zeros((1, filter_size), jnp.float32)
    fcw = jax.random.uniform(ks[4], (filter_size, n_predictions),
                             jnp.float32, -scale_fc, scale_fc)
    fcb = jax.random.uniform(ks[5], (1, n_predictions), jnp.float32,
                             -scale_fc, scale_fc)
    return (w0, b0, g0, beta0, w1, b1, g1, beta1, fcw, fcb)


if __name__ == "__main__":
    B, T = 2, 128
    input_size, filter_size, kernel_size, n_predictions = 32, 32, 3, 1

    key = jax.random.PRNGKey(0)
    k_x, k_p = jax.random.split(key)
    enc_out = jax.random.normal(k_x, (B, T, input_size), jnp.float32)
    lengths = jnp.array([T, T - 37], jnp.int32)
    enc_out_mask = (jnp.arange(T)[None, :] < lengths[:, None]).astype(
        jnp.float32)[..., None]                                # (B, T, 1)

    params = make_params(k_p, input_size, filter_size, kernel_size, n_predictions)

    out = jax.block_until_ready(temporal_predictor(enc_out, enc_out_mask, params))

    ref = reference(enc_out, enc_out_mask, params)
    # bf16 MXU operands (f32 accumulation) => tolerance relaxed vs the f32 reference.
    np.testing.assert_allclose(np.asarray(out), np.asarray(ref),
                               rtol=3e-2, atol=3e-2)
    print("KERNEL_OK")
</pallas_src>

<mosaic_0001>
module attributes {stable_mosaic.version = 11 : i64} {
  func.func @temporal_predictor_kernel(%arg0: i32, %arg1: memref<1x128x32xf32, #tpu.memory_space<vmem>>, %arg2: memref<1x128x1xf32, #tpu.memory_space<vmem>>, %arg3: memref<3x32x32xbf16, #tpu.memory_space<vmem>>, %arg4: memref<3x32x32xbf16, #tpu.memory_space<vmem>>, %arg5: memref<32x7xf32, #tpu.memory_space<vmem>>, %arg6: memref<1xf32, #tpu.memory_space<smem>>, %arg7: memref<1x1x128xf32, #tpu.memory_space<vmem>>) attributes {dimension_semantics = [#tpu.dimension_semantics<parallel>], iteration_bounds = array<i64: 2>, scalar_prefetch = 0 : i64, scratch_operands = 0 : i64, tpu.core_type = #tpu.core_type<tc>, window_params = [{transform_indices = @transform_0, window_bounds = array<i64: 1, 128, 32>}, {transform_indices = @transform_1, window_bounds = array<i64: 1, 128, 1>}, {pipeline_mode = #tpu.pipeline_mode<synchronous>, transform_indices = @transform_2, window_bounds = array<i64: 3, 32, 32>}, {pipeline_mode = #tpu.pipeline_mode<synchronous>, transform_indices = @transform_3, window_bounds = array<i64: 3, 32, 32>}, {pipeline_mode = #tpu.pipeline_mode<synchronous>, transform_indices = @transform_4, window_bounds = array<i64: 32, 7>}, {transform_indices = @transform_5, window_bounds = array<i64: 1>}, {transform_indices = @transform_6, window_bounds = array<i64: 1, 1, 128>}]} {
    %c0 = arith.constant 0 : index
    %c0_0 = arith.constant 0 : index
    %c0_1 = arith.constant 0 : index
    %0 = vector.load %arg1[%c0, %c0_0, %c0_1] : memref<1x128x32xf32, #tpu.memory_space<vmem>>, vector<1x128x32xf32>
    %1 = vector.shape_cast %0 : vector<1x128x32xf32> to vector<128x32xf32>
    %c0_2 = arith.constant 0 : index
    %c0_3 = arith.constant 0 : index
    %c0_4 = arith.constant 0 : index
    %2 = vector.load %arg2[%c0_2, %c0_3, %c0_4] : memref<1x128x1xf32, #tpu.memory_space<vmem>>, vector<1x128x1xf32>
    %3 = vector.shape_cast %2 : vector<1x128x1xf32> to vector<128x1xf32>
    %4 = vector.broadcast %3 : vector<128x1xf32> to vector<128x32xf32>
    %5 = arith.mulf %1, %4 : vector<128x32xf32>
    %6 = tpu.iota {dimensions = array<i32: 1>} : vector<1x128xi32>
    %c1_i32 = arith.constant 1 : i32
    %7 = vector.broadcast %c1_i32 : i32 to vector<1x128xi32>
    %8 = arith.cmpi sge, %6, %7 : vector<1x128xi32>
    %c129_i32 = arith.constant 129 : i32
    %9 = vector.broadcast %c129_i32 : i32 to vector<1x128xi32>
    %10 = arith.cmpi slt, %6, %9 : vector<1x128xi32>
    %11 = arith.andi %8, %10 : vector<1x128xi1>
    %c-1_i32 = arith.constant -1 : i32
    %12 = vector.broadcast %c-1_i32 : i32 to vector<1x128xi32>
    %13 = arith.cmpi sge, %6, %12 : vector<1x128xi32>
    %c127_i32 = arith.constant 127 : i32
    %14 = vector.broadcast %c127_i32 : i32 to vector<1x128xi32>
    %15 = arith.cmpi slt, %6, %14 : vector<1x128xi32>
    %16 = arith.andi %13, %15 : vector<1x128xi1>
    %c0_5 = arith.constant 0 : index
    %c0_6 = arith.constant 0 : index
    %17 = vector.load %arg5[%c0_5, %c0_6] : memref<32x7xf32, #tpu.memory_space<vmem>>, vector<32x1xf32>
    %c0_7 = arith.constant 0 : index
    %c1 = arith.constant 1 : index
    %18 = vector.load %arg5[%c0_7, %c1] : memref<32x7xf32, #tpu.memory_space<vmem>>, vector<32x1xf32>
    %c0_8 = arith.constant 0 : index
    %c2 = arith.constant 2 : index
    %19 = vector.load %arg5[%c0_8, %c2] : memref<32x7xf32, #tpu.memory_space<vmem>>, vector<32x1xf32>
    %20 = arith.truncf %5 : vector<128x32xf32> to vector<128x32xbf16>
    %c0_9 = arith.constant 0 : index
    %c0_10 = arith.constant 0 : index
    %c0_11 = arith.constant 0 : index
    %21 = vector.load %arg3[%c0_9, %c0_10, %c0_11] : memref<3x32x32xbf16, #tpu.memory_space<vmem>>, vector<1x32x32xbf16>
    %22 = vector.shape_cast %21 : vector<1x32x32xbf16> to vector<32x32xbf16>
    %cst = arith.constant dense<0.000000e+00> : vector<32x128xf32>
    %23 = tpu.matmul %22, %20, %cst {dimension_numbers = #tpu.dot_dimension_numbers<[1], [1], [0], [0], [0, 0, 1, 0], [], []>} : vector<32x32xbf16>, vector<128x32xbf16>, vector<32x128xf32> -> vector<32x128xf32>
    %c1_i32_12 = arith.constant 1 : i32
    %24 = tpu.dynamic_rotate %23 by %c1_i32_12 dim 1 : vector<32x128xf32>, i32 -> vector<32x128xf32>
    %cst_13 = arith.constant 0.000000e+00 : f32
    %25 = vector.shape_cast %11 : vector<1x128xi1> to vector<1x128xi1>
    %26 = vector.broadcast %25 : vector<1x128xi1> to vector<32x128xi1>
    %27 = vector.broadcast %cst_13 : f32 to vector<32x128xf32>
    %28 = arith.select %26, %24, %27 : vector<32x128xi1>, vector<32x128xf32>
    %c1_14 = arith.constant 1 : index
    %c0_15 = arith.constant 0 : index
    %c0_16 = arith.constant 0 : index
    %29 = vector.load %arg3[%c1_14, %c0_15, %c0_16] : memref<3x32x32xbf16, #tpu.memory_space<vmem>>, vector<1x32x32xbf16>
    %30 = vector.shape_cast %29 : vector<1x32x32xbf16> to vector<32x32xbf16>
    %cst_17 = arith.constant dense<0.000000e+00> : vector<32x128xf32>
    %31 = tpu.matmul %30, %20, %cst_17 {dimension_numbers = #tpu.dot_dimension_numbers<[1], [1], [0], [0], [0, 0, 1, 0], [], []>} : vector<32x32xbf16>, vector<128x32xbf16>, vector<32x128xf32> -> vector<32x128xf32>
    %32 = arith.addf %28, %31 : vector<32x128xf32>
    %c2_18 = arith.constant 2 : index
    %c0_19 = arith.constant 0 : index
    %c0_20 = arith.constant 0 : index
    %33 = vector.load %arg3[%c2_18, %c0_19, %c0_20] : memref<3x32x32xbf16, #tpu.memory_space<vmem>>, vector<1x32x32xbf16>
    %34 = vector.shape_cast %33 : vector<1x32x32xbf16> to vector<32x32xbf16>
    %cst_21 = arith.constant dense<0.000000e+00> : vector<32x128xf32>
    %35 = tpu.matmul %34, %20, %cst_21 {dimension_numbers = #tpu.dot_dimension_numbers<[1], [1], [0], [0], [0, 0, 1, 0], [], []>} : vector<32x32xbf16>, vector<128x32xbf16>, vector<32x128xf32> -> vector<32x128xf32>
    %c127_i32_22 = arith.constant 127 : i32
    %36 = tpu.dynamic_rotate %35 by %c127_i32_22 dim 1 : vector<32x128xf32>, i32 -> vector<32x128xf32>
    %cst_23 = arith.constant 0.000000e+00 : f32
    %37 = vector.shape_cast %16 : vector<1x128xi1> to vector<1x128xi1>
    %38 = vector.broadcast %37 : vector<1x128xi1> to vector<32x128xi1>
    %39 = vector.broadcast %cst_23 : f32 to vector<32x128xf32>
    %40 = arith.select %38, %36, %39 : vector<32x128xi1>, vector<32x128xf32>
    %41 = arith.addf %32, %40 : vector<32x128xf32>
    %42 = vector.broadcast %17 : vector<32x1xf32> to vector<32x128xf32>
    %43 = arith.addf %41, %42 : vector<32x128xf32>
    %cst_24 = arith.constant 0.000000e+00 : f32
    %44 = vector.broadcast %cst_24 : f32 to vector<32x128xf32>
    %45 = arith.maximumf %43, %44 : vector<32x128xf32>
    %cst_25 = arith.constant dense<0.000000e+00> : vector<128xf32>
    %46 = vector.multi_reduction <add>, %45, %cst_25 [0] : vector<32x128xf32> to vector<128xf32>
    %47 = vector.shape_cast %46 : vector<128xf32> to vector<1x128xf32>
    %cst_26 = arith.constant 3.200000e+01 : f32
    %48 = vector.broadcast %cst_26 : f32 to vector<1x128xf32>
    %49 = arith.divf %47, %48 : vector<1x128xf32>
    %50 = vector.broadcast %49 : vector<1x128xf32> to vector<32x128xf32>
    %51 = arith.subf %45, %50 : vector<32x128xf32>
    %52 = arith.mulf %51, %51 : vector<32x128xf32>
    %cst_27 = arith.constant dense<0.000000e+00> : vector<128xf32>
    %53 = vector.multi_reduction <add>, %52, %cst_27 [0] : vector<32x128xf32> to vector<128xf32>
    %54 = vector.shape_cast %53 : vector<128xf32> to vector<1x128xf32>
    %cst_28 = arith.constant 3.200000e+01 : f32
    %55 = vector.broadcast %cst_28 : f32 to vector<1x128xf32>
    %56 = arith.divf %54, %55 : vector<1x128xf32>
    %cst_29 = arith.constant 9.99999974E-6 : f32
    %57 = vector.broadcast %cst_29 : f32 to vector<1x128xf32>
    %58 = arith.addf %56, %57 : vector<1x128xf32>
    %59 = math.rsqrt %58 : vector<1x128xf32>
    %60 = vector.broadcast %59 : vector<1x128xf32> to vector<32x128xf32>
    %61 = arith.mulf %51, %60 : vector<32x128xf32>
    %62 = vector.broadcast %18 : vector<32x1xf32> to vector<32x128xf32>
    %63 = arith.mulf %61, %62 : vector<32x128xf32>
    %64 = vector.broadcast %19 : vector<32x1xf32> to vector<32x128xf32>
    %65 = arith.addf %63, %64 : vector<32x128xf32>
    %c0_30 = arith.constant 0 : index
    %c3 = arith.constant 3 : index
    %66 = vector.load %arg5[%c0_30, %c3] : memref<32x7xf32, #tpu.memory_space<vmem>>, vector<32x1xf32>
    %c0_31 = arith.constant 0 : index
    %c4 = arith.constant 4 : index
    %67 = vector.load %arg5[%c0_31, %c4] : memref<32x7xf32, #tpu.memory_space<vmem>>, vector<32x1xf32>
    %c0_32 = arith.constant 0 : index
    %c5 = arith.constant 5 : index
    %68 = vector.load %arg5[%c0_32, %c5] : memref<32x7xf32, #tpu.memory_space<vmem>>, vector<32x1xf32>
    %69 = arith.truncf %65 : vector<32x128xf32> to vector<32x128xbf16>
    %c0_33 = arith.constant 0 : index
    %c0_34 = arith.constant 0 : index
    %c0_35 = arith.constant 0 : index
    %70 = vector.load %arg4[%c0_33, %c0_34, %c0_35] : memref<3x32x32xbf16, #tpu.memory_space<vmem>>, vector<1x32x32xbf16>
    %71 = vector.shape_cast %70 : vector<1x32x32xbf16> to vector<32x32xbf16>
    %cst_36 = arith.constant dense<0.000000e+00> : vector<32x128xf32>
    %72 = tpu.matmul %71, %69, %cst_36 {dimension_numbers = #tpu.dot_dimension_numbers<[1], [0], [0], [1], [0, 0, 1, 1], [], []>} : vector<32x32xbf16>, vector<32x128xbf16>, vector<32x128xf32> -> vector<32x128xf32>
    %c1_i32_37 = arith.constant 1 : i32
    %73 = tpu.dynamic_rotate %72 by %c1_i32_37 dim 1 : vector<32x128xf32>, i32 -> vector<32x128xf32>
    %cst_38 = arith.constant 0.000000e+00 : f32
    %74 = vector.shape_cast %11 : vector<1x128xi1> to vector<1x128xi1>
    %75 = vector.broadcast %74 : vector<1x128xi1> to vector<32x128xi1>
    %76 = vector.broadcast %cst_38 : f32 to vector<32x128xf32>
    %77 = arith.select %75, %73, %76 : vector<32x128xi1>, vector<32x128xf32>
    %c1_39 = arith.constant 1 : index
    %c0_40 = arith.constant 0 : index
    %c0_41 = arith.constant 0 : index
    %78 = vector.load %arg4[%c1_39, %c0_40, %c0_41] : memref<3x32x32xbf16, #tpu.memory_space<vmem>>, vector<1x32x32xbf16>
    %79 = vector.shape_cast %78 : vector<1x32x32xbf16> to vector<32x32xbf16>
    %cst_42 = arith.constant dense<0.000000e+00> : vector<32x128xf32>
    %80 = tpu.matmul %79, %69, %cst_42 {dimension_numbers = #tpu.dot_dimension_numbers<[1], [0], [0], [1], [0, 0, 1, 1], [], []>} : vector<32x32xbf16>, vector<32x128xbf16>, vector<32x128xf32> -> vector<32x128xf32>
    %81 = arith.addf %77, %80 : vector<32x128xf32>
    %c2_43 = arith.constant 2 : index
    %c0_44 = arith.constant 0 : index
    %c0_45 = arith.constant 0 : index
    %82 = vector.load %arg4[%c2_43, %c0_44, %c0_45] : memref<3x32x32xbf16, #tpu.memory_space<vmem>>, vector<1x32x32xbf16>
    %83 = vector.shape_cast %82 : vector<1x32x32xbf16> to vector<32x32xbf16>
    %cst_46 = arith.constant dense<0.000000e+00> : vector<32x128xf32>
    %84 = tpu.matmul %83, %69, %cst_46 {dimension_numbers = #tpu.dot_dimension_numbers<[1], [0], [0], [1], [0, 0, 1, 1], [], []>} : vector<32x32xbf16>, vector<32x128xbf16>, vector<32x128xf32> -> vector<32x128xf32>
    %c127_i32_47 = arith.constant 127 : i32
    %85 = tpu.dynamic_rotate %84 by %c127_i32_47 dim 1 : vector<32x128xf32>, i32 -> vector<32x128xf32>
    %cst_48 = arith.constant 0.000000e+00 : f32
    %86 = vector.shape_cast %16 : vector<1x128xi1> to vector<1x128xi1>
    %87 = vector.broadcast %86 : vector<1x128xi1> to vector<32x128xi1>
    %88 = vector.broadcast %cst_48 : f32 to vector<32x128xf32>
    %89 = arith.select %87, %85, %88 : vector<32x128xi1>, vector<32x128xf32>
    %90 = arith.addf %81, %89 : vector<32x128xf32>
    %91 = vector.broadcast %66 : vector<32x1xf32> to vector<32x128xf32>
    %92 = arith.addf %90, %91 : vector<32x128xf32>
    %cst_49 = arith.constant 0.000000e+00 : f32
    %93 = vector.broadcast %cst_49 : f32 to vector<32x128xf32>
    %94 = arith.maximumf %92, %93 : vector<32x128xf32>
    %cst_50 = arith.constant dense<0.000000e+00> : vector<128xf32>
    %95 = vector.multi_reduction <add>, %94, %cst_50 [0] : vector<32x128xf32> to vector<128xf32>
    %96 = vector.shape_cast %95 : vector<128xf32> to vector<1x128xf32>
    %cst_51 = arith.constant 3.200000e+01 : f32
    %97 = vector.broadcast %cst_51 : f32 to vector<1x128xf32>
    %98 = arith.divf %96, %97 : vector<1x128xf32>
    %99 = vector.broadcast %98 : vector<1x128xf32> to vector<32x128xf32>
    %100 = arith.subf %94, %99 : vector<32x128xf32>
    %101 = arith.mulf %100, %100 : vector<32x128xf32>
    %cst_52 = arith.constant dense<0.000000e+00> : vector<128xf32>
    %102 = vector.multi_reduction <add>, %101, %cst_52 [0] : vector<32x128xf32> to vector<128xf32>
    %103 = vector.shape_cast %102 : vector<128xf32> to vector<1x128xf32>
    %cst_53 = arith.constant 3.200000e+01 : f32
    %104 = vector.broadcast %cst_53 : f32 to vector<1x128xf32>
    %105 = arith.divf %103, %104 : vector<1x128xf32>
    %cst_54 = arith.constant 9.99999974E-6 : f32
    %106 = vector.broadcast %cst_54 : f32 to vector<1x128xf32>
    %107 = arith.addf %105, %106 : vector<1x128xf32>
    %108 = math.rsqrt %107 : vector<1x128xf32>
    %109 = vector.broadcast %108 : vector<1x128xf32> to vector<32x128xf32>
    %110 = arith.mulf %100, %109 : vector<32x128xf32>
    %111 = vector.broadcast %67 : vector<32x1xf32> to vector<32x128xf32>
    %112 = arith.mulf %110, %111 : vector<32x128xf32>
    %113 = vector.broadcast %68 : vector<32x1xf32> to vector<32x128xf32>
    %114 = arith.addf %112, %113 : vector<32x128xf32>
    %c0_55 = arith.constant 0 : index
    %c6 = arith.constant 6 : index
    %115 = vector.load %arg5[%c0_55, %c6] : memref<32x7xf32, #tpu.memory_space<vmem>>, vector<32x1xf32>
    %116 = vector.broadcast %115 : vector<32x1xf32> to vector<32x128xf32>
    %117 = arith.mulf %114, %116 : vector<32x128xf32>
    %cst_56 = arith.constant dense<0.000000e+00> : vector<128xf32>
    %118 = vector.multi_reduction <add>, %117, %cst_56 [0] : vector<32x128xf32> to vector<128xf32>
    %119 = vector.shape_cast %118 : vector<128xf32> to vector<1x128xf32>
    %c0_57 = arith.constant 0 : index
    %120 = memref.load %arg6[%c0_57] : memref<1xf32, #tpu.memory_space<smem>>
    %121 = vector.broadcast %120 : f32 to vector<1x128xf32>
    %122 = arith.addf %119, %121 : vector<1x128xf32>
    %c0_58 = arith.constant 0 : index
    %c0_59 = arith.constant 0 : index
    %c0_60 = arith.constant 0 : index
    %123 = vector.load %arg7[%c0_58, %c0_59, %c0_60] : memref<1x1x128xf32, #tpu.memory_space<vmem>>, vector<1x1x128xf32>
    %124 = vector.shape_cast %123 : vector<1x1x128xf32> to vector<1x128xf32>
    %125 = vector.shape_cast %122 : vector<1x128xf32> to vector<1x1x128xf32>
    tpu.vector_store %arg7[%c0_58, %c0_59, %c0_60], %125 {strides = array<i32>} : memref<1x1x128xf32, #tpu.memory_space<vmem>>, vector<1x1x128xf32>,
    return
  }
  func.func @transform_0(%arg0: i32) -> (i32, i32, i32) {
    %c0_i32 = arith.constant 0 : i32
    %c0_i32_0 = arith.constant 0 : i32
    %c0_i32_1 = arith.constant 0 : i32
    return %arg0, %c0_i32, %c0_i32_0 : i32, i32, i32
  }
  func.func @transform_1(%arg0: i32) -> (i32, i32, i32) {
    %c0_i32 = arith.constant 0 : i32
    %c0_i32_0 = arith.constant 0 : i32
    %c0_i32_1 = arith.constant 0 : i32
    return %arg0, %c0_i32, %c0_i32_0 : i32, i32, i32
  }
  func.func @transform_2(%arg0: i32) -> (i32, i32, i32) {
    %c0_i32 = arith.constant 0 : i32
    %c0_i32_0 = arith.constant 0 : i32
    %c0_i32_1 = arith.constant 0 : i32
    %c0_i32_2 = arith.constant 0 : i32
    return %c0_i32, %c0_i32_0, %c0_i32_1 : i32, i32, i32
  }
  func.func @transform_3(%arg0: i32) -> (i32, i32, i32) {
    %c0_i32 = arith.constant 0 : i32
    %c0_i32_0 = arith.constant 0 : i32
    %c0_i32_1 = arith.constant 0 : i32
    %c0_i32_2 = arith.constant 0 : i32
    return %c0_i32, %c0_i32_0, %c0_i32_1 : i32, i32, i32
  }
  func.func @transform_4(%arg0: i32) -> (i32, i32) {
    %c0_i32 = arith.constant 0 : i32
    %c0_i32_0 = arith.constant 0 : i32
    %c0_i32_1 = arith.constant 0 : i32
    return %c0_i32, %c0_i32_0 : i32, i32
  }
  func.func @transform_5(%arg0: i32) -> i32 {
    %c0_i32 = arith.constant 0 : i32
    %c0_i32_0 = arith.constant 0 : i32
    return %c0_i32 : i32
  }
  func.func @transform_6(%arg0: i32) -> (i32, i32, i32) {
    %c0_i32 = arith.constant 0 : i32
    %c0_i32_0 = arith.constant 0 : i32
    %c0_i32_1 = arith.constant 0 : i32
    return %arg0, %c0_i32, %c0_i32_0 : i32, i32, i32
  }
}

</mosaic_0001>

<bundles_post_ra>
// kernel: tpu_custom_call.1
= control target key start
LH: loop header
LB: loop body
LE: loop exit
PB: predicated region body
PF: predicated region fallthrough
CT: control target
= control target key end

     0   :  { %s1676_s0 = inlined_call_operand.vmem [shape: f32[2,128,32], index: 0, kind: input, shape index: {}]   ;;  %s1677_s1 = inlined_call_operand.vmem [shape: f32[2,128,1], index: 1, kind: input, shape index: {}]   ;;  %s1678_s2 = inlined_call_operand.vmem [shape: bf16[3,32,32], index: 2, kind: input, shape index: {}]   ;;  %s1679_s3 = inlined_call_operand.vmem [shape: bf16[3,32,32], index: 3, kind: input, shape index: {}]   ;;  %s1680_s4 = inlined_call_operand.vmem [shape: f32[32,7], index: 4, kind: input, shape index: {}]   ;;  %s1681_s5 = inlined_call_operand.<no memory space> [shape: f32[1], index: 5, kind: input, shape index: {}]   ;;  %s1682_s6 = inlined_call_operand.hbm [shape: f32[2,1,128], index: 6, kind: output, shape index: {}]  }
   0x1   :  { %11 = sst [smem:[#allocation2]] %s1681_s5 }
   0x2   :  { %12 = vsyncpa [#allocation4], 0 }
   0x3   :  { %14 = vsyncpa [#allocation4 + $0x1], 0  ;;  %s1380_s23 = smov 0   ;;  %s1382_s24 = smov 0  }
   0x4   :  { %s1384_s25 = smov 0   ;;  %s1386_s26 = smov 0  }
   0x5 LB: > { %s1401_s5 = sadd.s32 4294967295, %s1330_s26   ;;  %s1090_s27 = sadd.s32 4294967294, %s1330_s26   ;;  %s1330_s26 = sphi %s1386_s26, %s1688_s26   ;;  %s1326_s25 = sphi %s1384_s25, %s1687_s25   ;;  %s1322_s24 = sphi %s1382_s24, %s1686_s24   ;;  %s1318_s23 = sphi %s1380_s23, %s1685_s23  }
   0x6   : > { %s1405_s28 = sadd.s32 1, %s1330_s26   ;;  %s163_s29 = sadd.s32 1, %s1326_s25 }
   0x7   : > { %s160_s30 = ssub.s32 %s1330_s26, %s1405_s28  ;;  %p173_p0 = scmp.ne.s32.totalorder %s1326_s25, %s1322_s24 }
   0x8   : > { %p161_p1 = scmp.eq.s32.totalorder %s160_s30, 0  ;;  %p174_p2 = scmp.eq.s32.totalorder %s1401_s5, 1 }
   0x9   : > { %p179_p3 = scmp.ne.s32.totalorder %s1322_s24, %s1318_s23  ;;  %p180_p4 = scmp.eq.s32.totalorder %s1090_s27, 1 }
   0xa   : > { %s1416_s7 = scalar_select %p161_p1, %s1326_s25, %s163_s29  }
   0xb   : > { %p1418_p5 = por %p174_p2, %p173_p0  ;;  %p1422_p6 = por %p180_p4, %p179_p3 }
   0xc   : > { %p1093_p7 = scmp.ge.s32.totalorder %s1330_s26, 1  ;;  %p226_p8 = scmp.lt.s32.totalorder %s1330_s26, 3 }
   0xe   : > { %p227_p9 = pnand %p1093_p7, %p226_p8 }
   0xf   : > { %p260_p10 = scmp.lt.s32.totalorder (!%p227_p9), %s1401_s5, 1  ;;  %s1333_s18 = smov (!%p227_p9), 1  }
  0x10   : > { %230 = sbr.rel (%p227_p9) target bundleno = 1009 (0x3f1), region = 44  ;;  %s1335_s19 = smov (!%p227_p9), 127  }
  0x11   : > { %s1019_s29 = scalar_lea.hbm (!%p227_p9), %s1682_s6, %s1401_s5  ;;  %s1288_s16 = scalar_lea.hbm (!%p227_p9), %s1682_s6, 2 }
  0x15   : > { %v1332_v0 = vmov 0   ;;  %s1430_s10 = scalar_select %p260_p10, %s1401_s5, 1  ;;  %v1459_v17 = vld [vmem:[%s1680_s4] sm:$0xff]  ;;  %v1465_v18 = vld [vmem:[%s1680_s4 + $0x8] sm:$0xff]  ;;  %vm433_vm0 = vcmask 261120  }
  0x16   : > { %1241 = vset.pattern.permute.xlu2 %v1332_v0  ;;  %1240 = vset.pattern.permute.xlu1 %v1332_v0 }
  0x17   : > { %1239 = vset.pattern.permute.xlu0 %v1332_v0  ;;  %s1176_s11 = sshll.u32 %s1430_s10, 7 }
  0x18   : > { %s1438_s14 = scalar_lea.vmem %s1677_s1, %s1176_s11  ;;  %s1473_s21 = scalar_lea.vmem %s1676_s0, %s1176_s11 }
  0x19   : > { %v301_v1 = vld [vmem:[%s1438_s14 + $0x70] sm:$0xff]  ;;  %v299_v2 = vld [vmem:[%s1438_s14 + $0x60] sm:$0xff]  ;;  %v302_v4 = vld [vmem:[%s1438_s14 + $0x78] sm:$0xff]  ;;  %s1023_s11 = sshll.u32 %s1019_s29, 4  ;;  %s1024_s11 = int_to_ptr.hbm [resolvable:$true] %s1023_s11 }
  0x1a   : > { %v297_v3 = vld [vmem:[%s1438_s14 + $0x50] sm:$0xff]  ;;  %375 = vperm.xlu0 %1239, %v301_v1   ;;  %365 = vperm.xlu1 %1240, %v299_v2   ;;  %v300_v5 = vld [vmem:[%s1438_s14 + $0x68] sm:$0xff]  ;;  %v298_v6 = vld [vmem:[%s1438_s14 + $0x58] sm:$0xff]  ;;  %s1282_s13 = sshra.s32 %s1024_s11, 4  ;;  %s1283_s13 = int_to_ptr.hbm [resolvable:$true] %s1282_s13 }
  0x1b   : > { %355 = vperm.xlu2 %1241, %v297_v3   ;;  %v296_v7 = vld [vmem:[%s1438_s14 + $0x48] sm:$0xff]  ;;  %v295_v8 = vld [vmem:[%s1438_s14 + $0x40] sm:$0xff]  ;;  %v293_v9 = vld [vmem:[%s1438_s14 + $0x30] sm:$0xff]  ;;  %p1289_p0 = scmp.lt.s32.totalorder %s1283_s13, %s1682_s6 }
  0x1c   : > { %v294_v10 = vld [vmem:[%s1438_s14 + $0x38] sm:$0xff]  ;;  %v291_v11 = vld [vmem:[%s1438_s14 + $0x20] sm:$0xff]  ;;  %v292_v12 = vld [vmem:[%s1438_s14 + $0x28] sm:$0xff] }
  0x1d   : > { %v290_v13 = vld [vmem:[%s1438_s14 + $0x18] sm:$0xff]  ;;  %v289_v14 = vld [vmem:[%s1438_s14 + $0x10] sm:$0xff]  ;;  %v287_v15 = vld [vmem:[%s1438_s14] sm:$0xff] }
  0x1e   : > { %v288_v16 = vld [vmem:[%s1438_s14 + $0x8] sm:$0xff]  ;;  %v285_v21 = vld [vmem:[%s1473_s21 + $0x70] sm:$0xff]  ;;  %v286_v22 = vld [vmem:[%s1473_s21 + $0x78] sm:$0xff]  ;;  %s1284_s14 = scalar_lea.hbm %s1283_s13, 1 }
  0x1f   : > { %v283_v27 = vld [vmem:[%s1473_s21 + $0x60] sm:$0xff]  ;;  %v284_v29 = vld [vmem:[%s1473_s21 + $0x68] sm:$0xff]  ;;  %v281_v35 = vld [vmem:[%s1473_s21 + $0x50] sm:$0xff]  ;;  %p1285_p11 = scmp.ne.s32.totalorder %s1283_s13, %s1284_s14  ;;  %p1290_p1 = scmp.lt.s32.totalorder %s1288_s16, %s1284_s14 }
  0x20   : > { %v282_v36 = vld [vmem:[%s1473_s21 + $0x58] sm:$0xff]  ;;  %v280_v44 = vld [vmem:[%s1473_s21 + $0x48] sm:$0xff]  ;;  %v279_v45 = vld [vmem:[%s1473_s21 + $0x40] sm:$0xff] }
  0x21   : > { %v278_v51 = vld [vmem:[%s1473_s21 + $0x38] sm:$0xff]  ;;  %v277_v53 = vld [vmem:[%s1473_s21 + $0x30] sm:$0xff]  ;;  %v275_v59 = vld [vmem:[%s1473_s21 + $0x20] sm:$0xff]  ;;  %p1286_p12 = pnand %p1285_p11, %p1418_p5  ;;  %p1291_p2 = por %p1290_p1, %p1289_p0 }
  0x22   : > { %380 = vperm.xlu0 %1239, %v302_v4   ;;  %370 = vperm.xlu1 %1240, %v300_v5   ;;  %v276_v60 = vld [vmem:[%s1473_s21 + $0x28] sm:$0xff]  ;;  %v274_v4 = vld [vmem:[%s1473_s21 + $0x18] sm:$0xff]  ;;  %v273_v5 = vld [vmem:[%s1473_s21 + $0x10] sm:$0xff] }
  0x23   : > { %360 = vperm.xlu2 %1241, %v298_v6   ;;  %p1287_p13 = pneg %p1286_p12 }
  0x25   : > { %p1292_p3 = pnand %p1291_p2, %p1287_p13 }
  0x2a   : > { %350 = vperm.xlu1 %1240, %v296_v7   ;;  %345 = vperm.xlu0 %1239, %v295_v8  }
  0x2b   : > { %335 = vperm.xlu2 %1241, %v293_v9  }
  0x32   : > { %340 = vperm.xlu0 %1239, %v294_v10   ;;  %325 = vperm.xlu1 %1240, %v291_v11   ;;  %v272_v11 = vld [vmem:[%s1473_s21 + $0x8] sm:$0xff] }
  0x33   : > { %330 = vperm.xlu2 %1241, %v292_v12   ;;  %v271_v12 = vld [vmem:[%s1473_s21] sm:$0xff] }
  0x3a   : > { %320 = vperm.xlu1 %1240, %v290_v13   ;;  %315 = vperm.xlu0 %1239, %v289_v14  }
  0x3b   : > { %305 = vperm.xlu2 %1241, %v287_v15  }
  0x42   : > { %310 = vperm.xlu0 %1239, %v288_v16  }
  0x43   : > { %601 = vperm.xlu2 %1241, %v1459_v17  }
  0x4a   : > { %606 = vperm.xlu0 %1239, %v1465_v18  }
  0x75   : > { %v356_v26 = vpop.permute.xlu2 %355 }
  0x76   : > { %v393_v38 = vmul.f32 %v356_v26, %v281_v35  ;;  %v1181_v26 = vld [vmem:[%s1678_s2 + $0x18] sm:$0xff] }
  0x7d   : > { %v361_v37 = vpop.permute.xlu2 %360 }
  0x7e   : > { %v394_v39 = vmul.f32 %v361_v37, %v282_v36  ;;  %v1539_v36 = vld [vmem:[%s1680_s4 + $0x18] sm:$0xff] }
  0x80   : > { %v416_v42 = vpack.c.bf16 %v394_v39, %v393_v38  ;;  %v1336_v38 = vmov 2  }
  0x82   : > { %v456_v48 = vsel %vm433_vm0, %v416_v42, 0 }
  0x85   : > { %v336_v52 = vpop.permute.xlu2 %335 }
  0x86   : > { %v389_v56 = vmul.f32 %v336_v52, %v277_v53 }
  0x8c   : > { %v376_v19 = vpop.permute.xlu0 %375  ;;  %v366_v20 = vpop.permute.xlu1 %365 }
  0x8d   : > { %v397_v24 = vmul.f32 %v376_v19, %v285_v21  ;;  %v395_v31 = vmul.f32 %v366_v20, %v283_v27  ;;  %v331_v63 = vpop.permute.xlu2 %330  ;;  %v1178_v21 = vld [vmem:[%s1678_s2] sm:$0xff] }
  0x8e   : > { %v388_v0 = vmul.f32 %v331_v63, %v276_v60 }
  0x94   : > { %v381_v23 = vpop.permute.xlu0 %380  ;;  %v371_v28 = vpop.permute.xlu1 %370 }
  0x95   : > { %v398_v25 = vmul.f32 %v381_v23, %v286_v22  ;;  %v396_v32 = vmul.f32 %v371_v28, %v284_v29  ;;  %v306_v15 = vpop.permute.xlu2 %305  ;;  %v1180_v22 = vld [vmem:[%s1678_s2 + $0x10] sm:$0xff]  ;;  %v1182_v23 = vld [vmem:[%s1678_s2 + $0x20] sm:$0xff]  ;;  %v1334_v28 = vmov 1  }
  0x96   : > { %v383_v16 = vmul.f32 %v306_v15, %v271_v12  ;;  %1242 = vset.pattern.permute.xlu1 %v1334_v28 }
  0x97   : > { %v418_v30 = vpack.c.bf16 %v398_v25, %v397_v24  ;;  %v417_v34 = vpack.c.bf16 %v396_v32, %v395_v31  ;;  %v1179_v24 = vld [vmem:[%s1678_s2 + $0x8] sm:$0xff] }
  0x98   : > { %v1183_v25 = vld [vmem:[%s1678_s2 + $0x28] sm:$0xff] }
  0x99   : > { %v462_v33 = vsel %vm433_vm0, %v418_v30, 0  ;;  %v459_v40 = vsel %vm433_vm0, %v417_v34, 0 }
  0x9a   : > { %464 = vmatpush.bf16.xpose.msra.mxu0 %v462_v33  ;;  %518 = vmatpush.bf16.xpose.msra.mxu1 %v462_v33 }
  0x9b   : > { %562 = vmatpush.bf16.xpose.msra.mxu2 %v462_v33  ;;  %v1531_v33 = vld [vmem:[%s1680_s4 + $0x10] sm:$0xff] }
  0x9c   : > { %v346_v41 = vpop.permute.xlu0 %345  ;;  %v351_v43 = vpop.permute.xlu1 %350 }
  0x9d   : > { %v392_v46 = vmul.f32 %v351_v43, %v280_v44  ;;  %v391_v47 = vmul.f32 %v346_v41, %v279_v45  ;;  %v602_v39 = vpop.permute.xlu2 %601  ;;  %v399_v44 = vlaneseq }
  0x9f   : > { %v415_v49 = vpack.c.bf16 %v392_v46, %v391_v47  ;;  %v1551_v46 = vand.u32 127, %v399_v44 }
  0xa1   : > { %v453_v55 = vsel %vm433_vm0, %v415_v49, 0  ;;  %vm401_vm1 = vcmp.ge.s32.totalorder %v1551_v46, 1  ;;  %vm405_vm2 = vcmp.lt.s32.totalorder %v1551_v46, 127 }
  0xa2   : > { %465 = vmatpush.bf16.xpose.msra.mxu0 %v459_v40  ;;  %519 = vmatpush.bf16.xpose.msra.mxu1 %v459_v40 }
  0xa3   : > { %563 = vmatpush.bf16.xpose.msra.mxu2 %v459_v40 }
  0xa4   : > { %v341_v50 = vpop.permute.xlu0 %340  ;;  %v326_v57 = vpop.permute.xlu1 %325 }
  0xa5   : > { %v390_v54 = vmul.f32 %v341_v50, %v278_v51  ;;  %v387_v61 = vmul.f32 %v326_v57, %v275_v59 }
  0xa7   : > { %v414_v58 = vpack.c.bf16 %v390_v54, %v389_v56  ;;  %v413_v2 = vpack.c.bf16 %v388_v0, %v387_v61 }
  0xa9   : > { %v450_v62 = vsel %vm433_vm0, %v414_v58, 0  ;;  %v447_v8 = vsel %vm433_vm0, %v413_v2, 0 }
  0xaa   : > { %466 = vmatpush.bf16.xpose.msra.mxu0 %v456_v48  ;;  %520 = vmatpush.bf16.xpose.msra.mxu1 %v456_v48 }
  0xab   : > { %564 = vmatpush.bf16.xpose.msra.mxu2 %v456_v48 }
  0xac   : > { %v316_v1 = vpop.permute.xlu0 %315  ;;  %v321_v3 = vpop.permute.xlu1 %320 }
  0xad   : > { %v386_v6 = vmul.f32 %v321_v3, %v274_v4  ;;  %v385_v7 = vmul.f32 %v316_v1, %v273_v5  ;;  %v1337_v1 = vmov 32.0  }
  0xae   : > { %1262 = vrcp.f32 %v1337_v1 }
  0xaf   : > { %v412_v9 = vpack.c.bf16 %v386_v6, %v385_v7 }
  0xb1   : > { %v444_v14 = vsel %vm433_vm0, %v412_v9, 0 }
  0xb2   : > { %467 = vmatpush.bf16.xpose.msra.mxu0 %v453_v55  ;;  %521 = vmatpush.bf16.xpose.msra.mxu1 %v453_v55 }
  0xb3   : > { %565 = vmatpush.bf16.xpose.msra.mxu2 %v453_v55 }
  0xb4   : > { %v311_v10 = vpop.permute.xlu0 %310 }
  0xb5   : > { %v384_v13 = vmul.f32 %v311_v10, %v272_v11 }
  0xb7   : > { %v411_v19 = vpack.c.bf16 %v384_v13, %v383_v16 }
  0xb9   : > { %v441_v20 = vsel %vm433_vm0, %v411_v19, 0 }
  0xba   : > { %468 = vmatpush.bf16.xpose.msra.mxu0 %v450_v62  ;;  %522 = vmatpush.bf16.xpose.msra.mxu1 %v450_v62 }
  0xbb   : > { %566 = vmatpush.bf16.xpose.msra.mxu2 %v450_v62 }
  0xbc   : > { %v607_v42 = vpop.permute.xlu0 %606 }
  0xc2   : > { %469 = vmatpush.bf16.xpose.msra.mxu0 %v447_v8  ;;  %523 = vmatpush.bf16.xpose.msra.mxu1 %v447_v8 }
  0xc3   : > { %567 = vmatpush.bf16.xpose.msra.mxu2 %v447_v8  ;;  %v1263_v8 = vpop.eup %1262 }
  0xc4   : > { %v637_v19 = vmul.f32 32.0, %v1263_v8  ;;  %vm641_vm3 = vweird.f32 %v1263_v8 }
  0xca   : > { %470 = vmatpush.bf16.xpose.msra.mxu0 %v444_v14  ;;  %524 = vmatpush.bf16.xpose.msra.mxu1 %v444_v14 }
  0xcb   : > { %568 = vmatpush.bf16.xpose.msra.mxu2 %v444_v14 }
  0xd2   : > { %471 = vmatpush.bf16.xpose.msra.mxu0 %v441_v20  ;;  %525 = vmatpush.bf16.xpose.msra.mxu1 %v441_v20 }
  0xd3   : > { %569 = vmatpush.bf16.xpose.msra.mxu2 %v441_v20 }
  0xd9   : > { %1106 = vmatmul.msk.bf16.vlgmr.msra.gmra.mxu0 %vm433_vm0, %v1178_v21  ;;  %1120 = vmatmul.msk.bf16.vlgmr.msra.gmra.mxu1 %vm433_vm0, %v1180_v22 }
  0xda   : > { %1134 = vmatmul.msk.bf16.vlgmr.msra.gmra.mxu2 %vm433_vm0, %v1182_v23 }
  0xe9   : > { %1107 = vmatmul.msk.bf16.gmra.mxu0 %vm433_vm0, %v1179_v24  ;;  %1121 = vmatmul.msk.bf16.gmra.mxu1 %vm433_vm0, %v1181_v26  ;;  %v638_v24 = vsub.f32 1.0, %v637_v19 }
  0xea   : > { %1135 = vmatmul.msk.bf16.gmra.mxu2 %vm433_vm0, %v1183_v25 }
 0x156   : > { %v473_v27 = vpop.f32.mrf.mxu0  ;;  %v527_v40 = vpop.f32.mrf.mxu1 }
 0x157   : > { %483 = vrot.lane.b32.xlu1 %v473_v27, %s1333_s18  ;;  %v639_v27 = vmul.f32 %v1263_v8, %v638_v24 }
 0x15d   : > { %v571_v29 = vpop.f32.mrf.mxu2 }
 0x15e   : > { %v475_v30 = vpop.f32.mrf.mxu0  ;;  %v529_v45 = vpop.f32.mrf.mxu1 }
 0x15f   : > { %581 = vrot.lane.b32.xlu1 %v571_v29, %s1335_s19  ;;  %485 = vrot.lane.b32.xlu2 %v475_v30, %s1333_s18  ;;  %v640_v30 = vadd.f32 %v1263_v8, %v639_v27  ;;  %v1186_v27 = vld [vmem:[%s1679_s3 + $0x10] sm:$0xff] }
 0x165   : > { %v573_v31 = vpop.f32.mrf.mxu2 }
 0x166   : > { %v478_v32 = vpop.f32.mrf.mxu0  ;;  %v532_v53 = vpop.f32.mrf.mxu1 }
 0x167   : > { %583 = vrot.lane.b32.xlu2 %v573_v31, %s1335_s19  ;;  %487 = vrot.lane.b32.xlu0 %v478_v32, %s1333_s18 }
 0x16d   : > { %v576_v34 = vpop.f32.mrf.mxu2 }
 0x16e   : > { %585 = vrot.lane.b32.xlu1 %v576_v34, %s1335_s19  ;;  %v480_v35 = vpop.f32.mrf.mxu0  ;;  %v534_v7 = vpop.f32.mrf.mxu1  ;;  %v1571_v34 = vsel %vm641_vm3, %v1263_v8, %v640_v30  ;;  %v1188_v30 = vld [vmem:[%s1679_s3 + $0x20] sm:$0xff] }
 0x16f   : > { %611 = vperm.xlu2 %1241, %v1531_v33   ;;  %489 = vrot.lane.b32.xlu0 %v480_v35, %s1333_s18 }
 0x175   : > { %v578_v37 = vpop.f32.mrf.mxu2 }
 0x176   : > { %587 = vrot.lane.b32.xlu1 %v578_v37, %s1335_s19 }
 0x177   : > { %616 = vperm.xlu0 %1239, %v1539_v36   ;;  %1243 = vset.pattern.permute.xlu2 %v1334_v28 }
 0x178   : > { %690 = vperm.xlu2 %1243, %v1539_v36  }
 0x17e   : > { %686 = vperm.xlu1 %1242, %v1531_v33  }
 0x17f   : > { %1244 = vset.pattern.permute.xlu0 %v1336_v38 }
 0x180   : > { %706 = vperm.xlu0 %1244, %v1531_v33   ;;  %678 = vperm.xlu2 %1243, %v1459_v17  }
 0x186   : > { %1245 = vset.pattern.permute.xlu1 %v1336_v38 }
 0x187   : > { %710 = vperm.xlu1 %1245, %v1539_v36  }
 0x188   : > { %702 = vperm.xlu0 %1244, %v1465_v18   ;;  %1247 = vset.pattern.permute.xlu2 %v1336_v38 }
 0x189   : > { %698 = vperm.xlu2 %1247, %v1459_v17  }
 0x18f   : > { %1246 = vset.pattern.permute.xlu1 %v1334_v28 }
 0x190   : > { %682 = vperm.xlu1 %1246, %v1465_v18  }
 0x1b9   : > { %v486_v43 = vpop.permute.xlu2 %485 }
 0x1ba   : > { %v494_v51 = vsel %vm401_vm1, %v486_v43, 0.0 }
 0x1bb   : > { %v538_v57 = vadd.f32 %v529_v45, %v494_v51 }
 0x1c1   : > { %v584_v49 = vpop.permute.xlu2 %583 }
 0x1c2   : > { %v592_v56 = vsel %vm405_vm2, %v584_v49, 0.0 }
 0x1c3   : > { %v596_v63 = vadd.f32 %v592_v56, %v538_v57 }
 0x1c5   : > { %v620_v5 = vadd.f32 %v607_v42, %v596_v63 }
 0x1c7   : > { %v624_v14 = vmax.f32 %v620_v5, 0.0 }
 0x1c9   : > { %v484_v41 = vpop.permute.xlu1 %483  ;;  %v612_v3 = vpop.permute.xlu2 %611 }
 0x1ca   : > { %v493_v50 = vsel %vm401_vm1, %v484_v41, 0.0 }
 0x1cb   : > { %v537_v55 = vadd.f32 %v527_v40, %v493_v50 }
 0x1d1   : > { %v582_v47 = vpop.permute.xlu1 %581 }
 0x1d2   : > { %v591_v52 = vsel %vm405_vm2, %v582_v47, 0.0 }
 0x1d3   : > { %v595_v58 = vadd.f32 %v591_v52, %v537_v55 }
 0x1d5   : > { %v619_v2 = vadd.f32 %v602_v39, %v595_v58 }
 0x1d7   : > { %v623_v9 = vmax.f32 %v619_v2, 0.0 }
 0x1d9   : > { %v488_v48 = vpop.permute.xlu0 %487  ;;  %v627_v20 = vadd.f32 %v624_v14, %v623_v9 }
 0x1da   : > { %v495_v54 = vsel %vm401_vm1, %v488_v48, 0.0 }
 0x1db   : > { %v539_v59 = vadd.f32 %v532_v53, %v495_v54 }
 0x1e0   : > { %v586_v60 = vpop.permute.xlu1 %585 }
 0x1e1   : > { %v593_v61 = vsel %vm405_vm2, %v586_v60, 0.0  ;;  %v490_v62 = vpop.permute.xlu0 %489 }
 0x1e2   : > { %v597_v0 = vadd.f32 %v593_v61, %v539_v59  ;;  %v496_v4 = vsel %vm401_vm1, %v490_v62, 0.0  ;;  %v691_v59 = vpop.permute.xlu2 %690 }
 0x1e3   : > { %v540_v10 = vadd.f32 %v534_v7, %v496_v4 }
 0x1e4   : > { %v621_v6 = vadd.f32 %v612_v3, %v597_v0 }
 0x1e6   : > { %v625_v15 = vmax.f32 %v621_v6, 0.0 }
 0x1e8   : > { %v588_v11 = vpop.permute.xlu1 %587  ;;  %v628_v22 = vadd.f32 %v627_v20, %v625_v15 }
 0x1e9   : > { %v594_v12 = vsel %vm405_vm2, %v588_v11, 0.0  ;;  %v617_v13 = vpop.permute.xlu0 %616 }
 0x1ea   : > { %v598_v16 = vadd.f32 %v594_v12, %v540_v10  ;;  %v679_v2 = vpop.permute.xlu2 %678 }
 0x1ec   : > { %v622_v21 = vadd.f32 %v617_v13, %v598_v16 }
 0x1ee   : > { %v626_v23 = vmax.f32 %v622_v21, 0.0 }
 0x1f0   : > { %v629_v25 = vadd.f32 %v628_v22, %v626_v23  ;;  %v687_v57 = vpop.permute.xlu1 %686 }
 0x1f2   : > { %v630_v26 = vrot.slane %v629_v25, 4  ;;  %v707_v3 = vpop.permute.xlu0 %706 }
 0x1f4   : > { %v631_v28 = vadd.f32 %v630_v26, %v629_v25  ;;  %v1184_v25 = vld [vmem:[%s1679_s3] sm:$0xff]  ;;  %v1185_v26 = vld [vmem:[%s1679_s3 + $0x8] sm:$0xff] }
 0x1f6   : > { %v632_v29 = vrot.slane %v631_v28, 2 }
 0x1f8   : > { %v633_v31 = vadd.f32 %v632_v29, %v631_v28  ;;  %v1187_v28 = vld [vmem:[%s1679_s3 + $0x18] sm:$0xff]  ;;  %v1338_v29 = vmov 3  }
 0x1f9   : > { %v711_v62 = vpop.permute.xlu1 %710  ;;  %1248 = vset.pattern.permute.xlu2 %v1338_v29  ;;  %1249 = vset.pattern.permute.xlu0 %v1338_v29 }
 0x1fa   : > { %v634_v32 = vrot.slane %v633_v31, 1  ;;  %v703_v20 = vpop.permute.xlu0 %702  ;;  %871 = vperm.xlu2 %1248, %v1459_v17   ;;  %1250 = vset.pattern.permute.xlu1 %v1338_v29 }
 0x1fc   : > { %v635_v35 = vadd.f32 %v634_v32, %v633_v31  ;;  %v1189_v31 = vld [vmem:[%s1679_s3 + $0x28] sm:$0xff] }
 0x1fe   : > { %v643_v37 = vmul.f32 %v1571_v34, %v635_v35 }
 0x200   : > { %v644_v38 = vsub.f32 %v623_v9, %v643_v37  ;;  %v645_v39 = vsub.f32 %v624_v14, %v643_v37  ;;  %v646_v40 = vsub.f32 %v625_v15, %v643_v37  ;;  %v647_v41 = vsub.f32 %v626_v23, %v643_v37  ;;  %v699_v15 = vpop.permute.xlu2 %698 }
 0x202   : > { %v648_v42 = vmul.f32 %v644_v38, %v644_v38  ;;  %v649_v43 = vmul.f32 %v645_v39, %v645_v39  ;;  %v650_v44 = vmul.f32 %v646_v40, %v646_v40  ;;  %v651_v47 = vmul.f32 %v647_v41, %v647_v41  ;;  %v683_v6 = vpop.permute.xlu1 %682 }
 0x204   : > { %v652_v45 = vadd.f32 %v649_v43, %v648_v42 }
 0x206   : > { %v653_v48 = vadd.f32 %v652_v45, %v650_v44 }
 0x208   : > { %v654_v49 = vadd.f32 %v653_v48, %v651_v47  ;;  %v1339_v48 = vmov 4  }
 0x20a   : > { %v655_v50 = vrot.slane %v654_v49, 4 }
 0x20c   : > { %v656_v51 = vadd.f32 %v655_v50, %v654_v49  ;;  %v1340_v49 = vmov 5   ;;  %v1341_v50 = vmov 6  }
 0x20e   : > { %v657_v52 = vrot.slane %v656_v51, 2 }
 0x210   : > { %v658_v53 = vadd.f32 %v657_v52, %v656_v51 }
 0x212   : > { %v659_v54 = vrot.slane %v658_v53, 1 }
 0x214   : > { %v660_v55 = vadd.f32 %v659_v54, %v658_v53 }
 0x216   : > { %v661_v56 = vmul.f32 %v660_v55, %v1571_v34 }
 0x218   : > { %v662_v58 = vadd.f32 1e-05, %v661_v56 }
 0x21a   : > { %1264 = vrsqrt.f32 %v662_v58  ;;  %vm669_vm5 = vweird.f32 %v662_v58 }
 0x220   : > { %v1265_v60 = vpop.eup %1264 }
 0x221   : > { %v664_v61 = vmul.f32 %v1265_v60, %v662_v58  ;;  %vm670_vm4 = vweird.f32 %v1265_v60 }
 0x222   : > { %vm671_vm6 = vmor %vm669_vm5, %vm670_vm4 }
 0x223   : > { %v665_v63 = vmul.f32 %v1265_v60, %v664_v61 }
 0x225   : > { %v666_v0 = vmul.f32 0.5, %v665_v63 }
 0x227   : > { %v667_v1 = vsub.f32 1.5, %v666_v0 }
 0x229   : > { %v668_v4 = vmul.f32 %v1265_v60, %v667_v1 }
 0x22b   : > { %v672_v5 = vsel %vm671_vm6, %v1265_v60, %v668_v4 }
 0x22c   : > { %v676_v7 = vmul.f32 %v672_v5, %v647_v41  ;;  %v675_v8 = vmul.f32 %v672_v5, %v646_v40  ;;  %v673_v9 = vmul.f32 %v672_v5, %v644_v38  ;;  %v674_v10 = vmul.f32 %v672_v5, %v645_v39 }
 0x22e   : > { %v696_v11 = vmul.f32 %v691_v59, %v676_v7  ;;  %v695_v12 = vmul.f32 %v687_v57, %v675_v8  ;;  %v693_v13 = vmul.f32 %v679_v2, %v673_v9  ;;  %v694_v14 = vmul.f32 %v683_v6, %v674_v10 }
 0x230   : > { %v715_v16 = vadd.f32 %v707_v3, %v695_v12  ;;  %v716_v19 = vadd.f32 %v711_v62, %v696_v11  ;;  %v714_v22 = vadd.f32 %v703_v20, %v694_v14  ;;  %v713_v23 = vadd.f32 %v699_v15, %v693_v13 }
 0x232   : > { %v718_v21 = vpack.c.bf16 %v716_v19, %v715_v16  ;;  %v717_v24 = vpack.c.bf16 %v714_v22, %v713_v23 }
 0x234   : > { %745 = vmatpush.bf16.msra.mxu3 %v718_v21 }
 0x238   : > { %746 = vmatpush.bf16.msra.mxu3 %v717_v24 }
 0x23b   : > { %1144 = vmatmul.msk.bf16.vlgmr.msra.gmra.mxu3 %vm433_vm0, %v1184_v25 }
 0x23c   : > { %797 = vmatpush.bf16.msrb.mxu3 %v718_v21 }
 0x240   : > { %798 = vmatpush.bf16.msrb.mxu3 %v717_v24 }
 0x244   : > { %841 = vmatpush.bf16.msra.mxu3 %v718_v21 }
 0x248   : > { %842 = vmatpush.bf16.msra.mxu3 %v717_v24 }
 0x24b   : > { %1145 = vmatmul.msk.bf16.gmra.mxu3 %vm433_vm0, %v1185_v26 }
 0x254   : > { %v872_v51 = vpop.permute.xlu2 %871 }
 0x25b   : > { %1158 = vmatmul.msk.bf16.vlgmr.msrb.gmra.mxu3 %vm433_vm0, %v1186_v27 }
 0x26b   : > { %1159 = vmatmul.msk.bf16.gmra.mxu3 %vm433_vm0, %v1187_v28 }
 0x27b   : > { %1172 = vmatmul.msk.bf16.vlgmr.msra.gmra.mxu3 %vm433_vm0, %v1188_v30 }
 0x28b   : > { %1173 = vmatmul.msk.bf16.gmra.mxu3 %vm433_vm0, %v1189_v31 }
 0x2be   : > { %v748_v32 = vpop.f32.mrf.mxu3 }
 0x2bf   : > { %758 = vrot.lane.b32.xlu1 %v748_v32, %s1333_s18 }
 0x2c6   : > { %v750_v35 = vpop.f32.mrf.mxu3 }
 0x2c7   : > { %760 = vrot.lane.b32.xlu2 %v750_v35, %s1333_s18 }
 0x2ce   : > { %v753_v37 = vpop.f32.mrf.mxu3 }
 0x2cf   : > { %762 = vrot.lane.b32.xlu0 %v753_v37, %s1333_s18 }
 0x2d6   : > { %v755_v38 = vpop.f32.mrf.mxu3 }
 0x2d7   : > { %764 = vrot.lane.b32.xlu0 %v755_v38, %s1333_s18  ;;  %s1006_s18 = sld [smem:[#allocation2]] }
 0x2de   : > { %v800_v39 = vpop.f32.mrf.mxu3 }
 0x2df   : > { %875 = vperm.xlu0 %1249, %v1465_v18  }
 0x2e6   : > { %v802_v40 = vpop.f32.mrf.mxu3 }
 0x2e7   : > { %1252 = vset.pattern.permute.xlu0 %v1339_v48 }
 0x2e8   : > { %942 = vperm.xlu0 %1252, %v1465_v18  }
 0x2ee   : > { %v805_v41 = vpop.f32.mrf.mxu3 }
 0x2f0   : > { %1257 = vset.pattern.permute.xlu0 %v1340_v49 }
 0x2f1   : > { %966 = vperm.xlu0 %1257, %v1531_v33  }
 0x2f6   : > { %v1605_v42 = vpop.f32.mrf.mxu3 }
 0x2f9   : > { %1261 = vset.pattern.permute.xlu0 %v1341_v50 }
 0x2fa   : > { %990 = vperm.xlu0 %1261, %v1539_v36  }
 0x2fe   : > { %v844_v43 = vpop.f32.mrf.mxu3 }
 0x2ff   : > { %854 = vrot.lane.b32.xlu1 %v844_v43, %s1335_s19 }
 0x306   : > { %v846_v44 = vpop.f32.mrf.mxu3 }
 0x307   : > { %856 = vrot.lane.b32.xlu2 %v846_v44, %s1335_s19 }
 0x30e   : > { %v849_v45 = vpop.f32.mrf.mxu3 }
 0x30f   : > { %858 = vrot.lane.b32.xlu1 %v849_v45, %s1335_s19  ;;  %879 = vperm.xlu2 %1248, %v1531_v33  }
 0x316   : > { %v851_v47 = vpop.f32.mrf.mxu3 }
 0x317   : > { %860 = vrot.lane.b32.xlu1 %v851_v47, %s1335_s19  ;;  %1251 = vset.pattern.permute.xlu2 %v1339_v48  ;;  %s258_s19 = sand.u32 1, %s1322_s24  }
 0x318   : > { %938 = vperm.xlu2 %1251, %v1459_v17   ;;  %s259_s30 = scalar_lea.vmem [#allocation3], %s258_s19  ;;  %s1011_s12 = scalar_lea.sflag [#allocation4], %s258_s19 }
 0x319   : > { %s1021_s10 = sshll.u32 %s259_s30, 4  ;;  %s1022_s10 = int_to_ptr.vmem [resolvable:$true] %s1021_s10 }
 0x31f   : > { %883 = vperm.xlu1 %1250, %v1539_v36  }
 0x320   : > { %1254 = vset.pattern.permute.xlu2 %v1340_v49 }
 0x321   : > { %958 = vperm.xlu2 %1254, %v1459_v17   ;;  %v761_v55 = vpop.permute.xlu2 %760 }
 0x327   : > { %1253 = vset.pattern.permute.xlu1 %v1339_v48 }
 0x328   : > { %946 = vperm.xlu1 %1253, %v1531_v33  }
 0x329   : > { %1256 = vset.pattern.permute.xlu2 %v1339_v48 }
 0x32a   : > { %950 = vperm.xlu2 %1256, %v1539_v36  }
 0x330   : > { %1255 = vset.pattern.permute.xlu1 %v1340_v49 }
 0x331   : > { %962 = vperm.xlu1 %1255, %v1465_v18   ;;  %v759_v52 = vpop.permute.xlu1 %758 }
 0x332   : > { %1259 = vset.pattern.permute.xlu2 %v1341_v50  ;;  %v766_v56 = vsel %vm401_vm1, %v759_v52, 0.0 }
 0x333   : > { %982 = vperm.xlu2 %1259, %v1465_v18  }
 0x339   : > { %1258 = vset.pattern.permute.xlu1 %v1341_v50 }
 0x33a   : > { %978 = vperm.xlu1 %1258, %v1459_v17   ;;  %v767_v17 = vsel %vm401_vm1, %v761_v55, 0.0 }
 0x33b   : > { %986 = vperm.xlu2 %1259, %v1531_v33   ;;  %v811_v62 = vadd.f32 %v802_v40, %v767_v17 }
 0x341   : > { %v763_v53 = vpop.permute.xlu0 %762 }
 0x342   : > { %1260 = vset.pattern.permute.xlu1 %v1340_v49  ;;  %v768_v18 = vsel %vm401_vm1, %v763_v53, 0.0 }
 0x343   : > { %970 = vperm.xlu1 %1260, %v1539_v36   ;;  %v810_v36 = vadd.f32 %v800_v39, %v766_v56  ;;  %v812_v63 = vadd.f32 %v805_v41, %v768_v18 }
 0x349   : > { %v765_v57 = vpop.permute.xlu0 %764 }
 0x34a   : > { %v769_v6 = vsel %vm401_vm1, %v765_v57, 0.0 }
 0x34b   : > { %v813_v11 = vadd.f32 %v1605_v42, %v769_v6 }
 0x351   : > { %v876_v3 = vpop.permute.xlu0 %875 }
 0x361   : > { %v857_v59 = vpop.permute.xlu2 %856 }
 0x362   : > { %v863_v60 = vsel %vm405_vm2, %v857_v59, 0.0 }
 0x363   : > { %v867_v1 = vadd.f32 %v863_v60, %v811_v62 }
 0x365   : > { %v887_v8 = vadd.f32 %v876_v3, %v867_v1 }
 0x367   : > { %v891_v13 = vmax.f32 %v887_v8, 0.0 }
 0x369   : > { %v880_v7 = vpop.permute.xlu2 %879 }
 0x371   : > { %v855_v54 = vpop.permute.xlu1 %854 }
 0x372   : > { %v862_v33 = vsel %vm405_vm2, %v855_v54, 0.0  ;;  %v939_v45 = vpop.permute.xlu2 %938 }
 0x373   : > { %v866_v0 = vadd.f32 %v862_v33, %v810_v36 }
 0x375   : > { %v886_v5 = vadd.f32 %v872_v51, %v866_v0 }
 0x377   : > { %v890_v12 = vmax.f32 %v886_v5, 0.0 }
 0x379   : > { %v894_v19 = vadd.f32 %v891_v13, %v890_v12 }
 0x37b   : > { %v959_v53 = vpop.permute.xlu2 %958 }
 0x381   : > { %v859_v58 = vpop.permute.xlu1 %858 }
 0x382   : > { %v864_v61 = vsel %vm405_vm2, %v859_v58, 0.0  ;;  %v943_v58 = vpop.permute.xlu0 %942 }
 0x383   : > { %v868_v2 = vadd.f32 %v864_v61, %v812_v63 }
 0x384   : > { %v951_v57 = vpop.permute.xlu2 %950 }
 0x385   : > { %v888_v9 = vadd.f32 %v880_v7, %v868_v2 }
 0x387   : > { %v892_v14 = vmax.f32 %v888_v9, 0.0 }
 0x389   : > { %v861_v4 = vpop.permute.xlu1 %860  ;;  %v895_v21 = vadd.f32 %v894_v19, %v892_v14 }
 0x38a   : > { %v865_v10 = vsel %vm405_vm2, %v861_v4, 0.0  ;;  %v967_v63 = vpop.permute.xlu0 %966 }
 0x38b   : > { %v869_v15 = vadd.f32 %v865_v10, %v813_v11 }
 0x38d   : > { %v983_v62 = vpop.permute.xlu2 %982 }
 0x391   : > { %v884_v16 = vpop.permute.xlu1 %883 }
 0x392   : > { %v889_v20 = vadd.f32 %v884_v16, %v869_v15  ;;  %v991_v16 = vpop.permute.xlu0 %990 }
 0x394   : > { %v893_v22 = vmax.f32 %v889_v20, 0.0 }
 0x395   : > { %v987_v15 = vpop.permute.xlu2 %986 }
 0x396   : > { %v896_v23 = vadd.f32 %v895_v21, %v893_v22 }
 0x398   : > { %v897_v24 = vrot.slane %v896_v23, 4 }
 0x39a   : > { %v898_v25 = vadd.f32 %v897_v24, %v896_v23  ;;  %v947_v50 = vpop.permute.xlu1 %946 }
 0x39c   : > { %v899_v26 = vrot.slane %v898_v25, 2 }
 0x39e   : > { %v900_v27 = vadd.f32 %v899_v26, %v898_v25 }
 0x3a0   : > { %v901_v28 = vrot.slane %v900_v27, 1 }
 0x3a2   : > { %v902_v29 = vadd.f32 %v901_v28, %v900_v27 }
 0x3a3   : > { %v963_v56 = vpop.permute.xlu1 %962 }
 0x3a4   : > { %v903_v46 = vmul.f32 %v902_v29, %v1571_v34  ;;  %v1007_v29 = vstv %s1006_s18 }
 0x3a6   : > { %v904_v30 = vsub.f32 %v890_v12, %v903_v46  ;;  %v905_v31 = vsub.f32 %v891_v13, %v903_v46  ;;  %v906_v32 = vsub.f32 %v892_v14, %v903_v46  ;;  %v907_v35 = vsub.f32 %v893_v22, %v903_v46 }
 0x3a8   : > { %v908_v37 = vmul.f32 %v904_v30, %v904_v30  ;;  %v909_v38 = vmul.f32 %v905_v31, %v905_v31  ;;  %v910_v39 = vmul.f32 %v906_v32, %v906_v32  ;;  %v911_v41 = vmul.f32 %v907_v35, %v907_v35 }
 0x3aa   : > { %v912_v40 = vadd.f32 %v909_v38, %v908_v37 }
 0x3ac   : > { %v913_v42 = vadd.f32 %v912_v40, %v910_v39  ;;  %v979_v36 = vpop.permute.xlu1 %978 }
 0x3ae   : > { %v914_v43 = vadd.f32 %v913_v42, %v911_v41 }
 0x3b0   : > { %v915_v44 = vrot.slane %v914_v43, 4 }
 0x3b2   : > { %v916_v47 = vadd.f32 %v915_v44, %v914_v43 }
 0x3b4   : > { %v917_v48 = vrot.slane %v916_v47, 2 }
 0x3b5   : > { %v971_v8 = vpop.permute.xlu1 %970 }
 0x3b6   : > { %v918_v49 = vadd.f32 %v917_v48, %v916_v47 }
 0x3b8   : > { %v919_v51 = vrot.slane %v918_v49, 1 }
 0x3ba   : > { %v920_v52 = vadd.f32 %v919_v51, %v918_v49 }
 0x3bc   : > { %v921_v54 = vmul.f32 %v920_v52, %v1571_v34 }
 0x3be   : > { %v922_v55 = vadd.f32 1e-05, %v921_v54 }
 0x3c0   : > { %1266 = vrsqrt.f32 %v922_v55  ;;  %vm929_vm8 = vweird.f32 %v922_v55 }
 0x3c6   : > { %v1267_v59 = vpop.eup %1266 }
 0x3c7   : > { %v924_v17 = vmul.f32 %v1267_v59, %v922_v55  ;;  %vm930_vm7 = vweird.f32 %v1267_v59 }
 0x3c8   : > { %vm931_vm9 = vmor %vm929_vm8, %vm930_vm7 }
 0x3c9   : > { %v925_v18 = vmul.f32 %v1267_v59, %v924_v17 }
 0x3cb   : > { %v926_v33 = vmul.f32 0.5, %v925_v18 }
 0x3cd   : > { %v927_v60 = vsub.f32 1.5, %v926_v33 }
 0x3cf   : > { %v928_v61 = vmul.f32 %v1267_v59, %v927_v60 }
 0x3d1   : > { %v932_v0 = vsel %vm931_vm9, %v1267_v59, %v928_v61 }
 0x3d2   : > { %v933_v1 = vmul.f32 %v932_v0, %v904_v30  ;;  %v935_v34 = vmul.f32 %v932_v0, %v906_v32  ;;  %v936_v2 = vmul.f32 %v932_v0, %v907_v35  ;;  %v934_v3 = vmul.f32 %v932_v0, %v905_v31 }
 0x3d4   : > { %v953_v4 = vmul.f32 %v939_v45, %v933_v1  ;;  %v955_v5 = vmul.f32 %v947_v50, %v935_v34  ;;  %v956_v6 = vmul.f32 %v951_v57, %v936_v2  ;;  %v954_v7 = vmul.f32 %v943_v58, %v934_v3 }
 0x3d6   : > { %v973_v9 = vadd.f32 %v959_v53, %v953_v4  ;;  %v974_v10 = vadd.f32 %v963_v56, %v954_v7  ;;  %v975_v11 = vadd.f32 %v967_v63, %v955_v5  ;;  %v976_v14 = vadd.f32 %v971_v8, %v956_v6 }
 0x3d8   : > { %v994_v12 = vmul.f32 %v983_v62, %v974_v10  ;;  %v993_v13 = vmul.f32 %v979_v36, %v973_v9  ;;  %v995_v20 = vmul.f32 %v987_v15, %v975_v11  ;;  %v996_v22 = vmul.f32 %v991_v16, %v976_v14 }
 0x3da   : > { %v997_v19 = vadd.f32 %v994_v12, %v993_v13 }
 0x3dc   : > { %v998_v21 = vadd.f32 %v997_v19, %v995_v20 }
 0x3de   : > { %v999_v23 = vadd.f32 %v998_v21, %v996_v22 }
 0x3e0   : > { %v1000_v24 = vrot.slane %v999_v23, 4 }
 0x3e2   : > { %v1001_v25 = vadd.f32 %v1000_v24, %v999_v23 }
 0x3e4   : > { %v1002_v26 = vrot.slane %v1001_v25, 2 }
 0x3e6   : > { %v1003_v27 = vadd.f32 %v1002_v26, %v1001_v25 }
 0x3e8   : > { %v1004_v28 = vrot.slane %v1003_v27, 1 }
 0x3ea   : > { %v1005_v46 = vadd.f32 %v1004_v28, %v1003_v27 }
 0x3ec   : > { %v1008_v30 = vadd.f32 %v1007_v29, %v1005_v46 }
 0x3ee   : > { %1009 = vst [vmem:[%s259_s30] sm:$0x1] %v1008_v30 }
 0x3ef   : > { %1295 = shalt.err (!%p1292_p3)
}
 0x3f0   : > { %1190 = dma.vmem_to_hbm [thread:$0]  (%p1418_p5), %s1022_s10, 16, %s1024_s11, %s1011_s12  }
 0x3f1 PF: > { %p1196_p4 = scmp.ge.s32.totalorder %s1330_s26, 2  ;;  %s1035_s21 = sand.u32 1, %s1318_s23  }
 0x3f2   : > { %s1036_s18 = scalar_lea.sflag [#allocation4], %s1035_s21 }
 0x3f3   : > { %p1193_p7 = pnand %p1196_p4, %p1422_p6 }
 0x3f5   : > { %p1194_p8 = pneg %p1193_p7 }
 0x3f7   : > { %1313 = dma.done.wait (%p1194_p8), %s1036_s18, 16  }
 0x3f8   : > { %1315 = vsyncadd (%p1194_p8), %s1036_s18, 4294967280  ;;  %p17_p9 = scmp.ge.s32.totalorder %s1405_s28, 4   ;;  %s1685_s23 = smov %s1322_s24 }
 0x3f9   : > { %s1686_s24 = smov %s1326_s25  ;;  %s1687_s25 = smov %s1416_s7 }
 0x3fa   : > { %s1688_s26 = smov %s1405_s28  ;;  %19 = sbr.rel (!%p17_p9) target bundleno = 5 (0x5), region = 86 }
 0x3ff   :  { %1041 = vsyncpa [#allocation4], 1 }
 0x400   :  { %1043 = vsyncpa [#allocation4 + $0x1], 1 }

</bundles_post_ra>
